<compile_context>
chip_gen: v6e
topology: v6e:2x2x1
jax: 0.10.0
libtpu: 0.0.40
codegen_flags: <defaults>
</compile_context>

<pallas_src>
import functools

import jax
import jax.numpy as jnp
from jax.experimental import pallas as pl
from jax.experimental.pallas import tpu as pltpu


def _round_up(n, m):
    return (n + m - 1) // m * m


def _gdrop_elem_kernel(x_ref, n_ref, o_ref, *, alpha):
    # eps = n * alpha + 1, computed in f32 then cast once to the I/O dtype so the
    # big multiply runs natively in bf16 on v6e/v7x (no-op casts for f32).
    eps = (n_ref[...].astype(jnp.float32) * alpha + 1.0).astype(x_ref.dtype)
    o_ref[...] = (x_ref[...] * eps).astype(o_ref.dtype)


def _gdrop_bcast_kernel(x_ref, n_ref, o_ref, *, alpha):
    # x block: (TILE_B, TILE_C); noise block: (1, TILE_C) broadcast over rows.
    eps = (n_ref[...].astype(jnp.float32) * alpha + 1.0).astype(x_ref.dtype)
    o_ref[...] = (x_ref[...] * eps).astype(o_ref.dtype)


def _gdrop_elementwise(x, noise, alpha):
    """fixed=False path: per-element noise. Flatten to a lane-dense (rows, 512) slab."""
    orig_shape = x.shape
    dtype = x.dtype
    n_elems = 1
    for s in orig_shape:
        n_elems *= int(s)

    LANES = 512                                   # multiple of 128 -> unmasked vst
    rows = -(-n_elems // LANES)                   # cdiv
    tile_r = min(1024, _round_up(rows, 8))        # ~2 MiB f32 per block at 1024x512
    rows_p = _round_up(rows, tile_r)
    n_pad = rows_p * LANES

    xf = jnp.pad(x.reshape(-1), (0, n_pad - n_elems)).reshape(rows_p, LANES)
    nf = jnp.pad(noise.reshape(-1), (0, n_pad - n_elems)).reshape(rows_p, LANES)

    kernel = functools.partial(_gdrop_elem_kernel, alpha=alpha)
    out = pl.pallas_call(
        kernel,
        out_shape=jax.ShapeDtypeStruct((rows_p, LANES), dtype),
        grid=(rows_p // tile_r,),
        in_specs=[
            pl.BlockSpec((tile_r, LANES), lambda i: (i, 0)),
            pl.BlockSpec((tile_r, LANES), lambda i: (i, 0)),
        ],
        out_specs=pl.BlockSpec((tile_r, LANES), lambda i: (i, 0)),
        compiler_params=pltpu.CompilerParams(
            dimension_semantics=("parallel",),    # independent tiles -> megacore-friendly
        ),
    )(xf, nf)
    return out.reshape(-1)[:n_elems].reshape(orig_shape)


def _gdrop_fixed(x, noise, alpha):
    """fixed=True path: one (1, S, D) noise slab broadcast across the batch."""
    B, S, D = x.shape
    dtype = x.dtype
    C = S * D

    x2 = x.reshape(B, C)
    n2 = noise.reshape(1, C)

    tile_c = min(2048, _round_up(C, 128))         # lane-dense columns
    c_pad = _round_up(C, tile_c)
    tile_b = min(256, _round_up(B, 8))            # <= 256x2048x4B = 2 MiB f32 per block
    b_pad = _round_up(B, tile_b)

    x2 = jnp.pad(x2, ((0, b_pad - B), (0, c_pad - C)))
    n2 = jnp.pad(n2, ((0, 0), (0, c_pad - C)))

    kernel = functools.partial(_gdrop_bcast_kernel, alpha=alpha)
    out = pl.pallas_call(
        kernel,
        out_shape=jax.ShapeDtypeStruct((b_pad, c_pad), dtype),
        grid=(b_pad // tile_b, c_pad // tile_c),
        in_specs=[
            pl.BlockSpec((tile_b, tile_c), lambda i, j: (i, j)),
            pl.BlockSpec((1, tile_c), lambda i, j: (0, j)),   # noise reused across batch
        ],
        out_specs=pl.BlockSpec((tile_b, tile_c), lambda i, j: (i, j)),
        compiler_params=pltpu.CompilerParams(
            dimension_semantics=("parallel", "parallel"),
        ),
    )(x2, n2)
    return out[:B, :C].reshape(B, S, D)


def gaussian_dropout(x, seed, *, alpha=1.0, fixed=False, training=True):
    """Pallas implementation of GaussianDropout.forward for (B, S, D) inputs."""
    if not training:
        return x
    alpha = float(alpha)
    B, S, D = x.shape
    key = jax.random.PRNGKey(seed)
    if fixed:
        # One noise slab, broadcast across the batch (matches torch.randn((1, S, D))).
        noise = jax.random.normal(key, (1, S, D), dtype=jnp.float32).astype(x.dtype)
        return _gdrop_fixed(x, noise, alpha)
    else:
        # Independent noise per element (matches torch.randn(x.size())).
        noise = jax.random.normal(key, (B, S, D), dtype=jnp.float32).astype(x.dtype)
        return _gdrop_elementwise(x, noise, alpha)


if __name__ == "__main__":
    key = jax.random.PRNGKey(0)
    B, S, D = 2, 8, 32
    x = jax.random.normal(key, (B, S, D), dtype=jnp.float32)

    # --- Non-fixed mode: per-element noise -----------------------------------
    seed_nf, alpha_nf = 42, 1.0
    out = gaussian_dropout(x, seed=seed_nf, alpha=alpha_nf, fixed=False)
    out = jax.block_until_ready(out)
    assert out.shape == x.shape and out.dtype == x.dtype
    noise_ref = jax.random.normal(jax.random.PRNGKey(seed_nf), (B, S, D), dtype=jnp.float32)
    ref = x * (noise_ref * alpha_nf + 1.0)
    assert jnp.allclose(out, ref, rtol=1e-5, atol=1e-6)

    # --- Fixed mode: noise broadcast across the batch -------------------------
    seed_f, alpha_f = 7, 0.5
    out_fixed = gaussian_dropout(x, seed=seed_f, alpha=alpha_f, fixed=True)
    out_fixed = jax.block_until_ready(out_fixed)
    noise_f = jax.random.normal(jax.random.PRNGKey(seed_f), (1, S, D), dtype=jnp.float32)
    ref_fixed = x * (noise_f * alpha_f + 1.0)
    assert jnp.allclose(out_fixed, ref_fixed, rtol=1e-5, atol=1e-6)
    # The implied multiplier must be identical for every batch element.
    ratio0 = out_fixed[0] / x[0]
    ratio1 = out_fixed[1] / x[1]
    assert jnp.allclose(ratio0, ratio1, rtol=1e-4, atol=1e-5)

    # --- Eval mode passthrough -------------------------------------------------
    out_eval = gaussian_dropout(x, seed=0, training=False)
    assert jnp.array_equal(out_eval, x)

    print("KERNEL_OK")
</pallas_src>

<mosaic_0001>
module attributes {stable_mosaic.version = 11 : i64} {
  func.func @_gdrop_elem_kernel(%arg0: i32, %arg1: memref<8x512xf32, #tpu.memory_space<vmem>>, %arg2: memref<8x512xf32, #tpu.memory_space<vmem>>, %arg3: memref<8x512xf32, #tpu.memory_space<vmem>>) attributes {dimension_semantics = [#tpu.dimension_semantics<parallel>], iteration_bounds = array<i64: 1>, scalar_prefetch = 0 : i64, scratch_operands = 0 : i64, tpu.core_type = #tpu.core_type<tc>, window_params = [{transform_indices = @transform_0, window_bounds = array<i64: 8, 512>}, {transform_indices = @transform_1, window_bounds = array<i64: 8, 512>}, {transform_indices = @transform_2, window_bounds = array<i64: 8, 512>}]} {
    %c0 = arith.constant 0 : index
    %c0_0 = arith.constant 0 : index
    %0 = vector.load %arg2[%c0, %c0_0] : memref<8x512xf32, #tpu.memory_space<vmem>>, vector<8x512xf32>
    %cst = arith.constant 1.000000e+00 : f32
    %1 = vector.broadcast %cst : f32 to vector<8x512xf32>
    %2 = arith.mulf %0, %1 : vector<8x512xf32>
    %cst_1 = arith.constant 1.000000e+00 : f32
    %3 = vector.broadcast %cst_1 : f32 to vector<8x512xf32>
    %4 = arith.addf %2, %3 : vector<8x512xf32>
    %c0_2 = arith.constant 0 : index
    %c0_3 = arith.constant 0 : index
    %5 = vector.load %arg1[%c0_2, %c0_3] : memref<8x512xf32, #tpu.memory_space<vmem>>, vector<8x512xf32>
    %6 = arith.mulf %5, %4 : vector<8x512xf32>
    %c0_4 = arith.constant 0 : index
    %c0_5 = arith.constant 0 : index
    %7 = vector.load %arg3[%c0_4, %c0_5] : memref<8x512xf32, #tpu.memory_space<vmem>>, vector<8x512xf32>
    tpu.vector_store %arg3[%c0_4, %c0_5], %6 {strides = array<i32>} : memref<8x512xf32, #tpu.memory_space<vmem>>, vector<8x512xf32>,
    return
  }
  func.func @transform_0(%arg0: i32) -> (i32, i32) {
    %c0_i32 = arith.constant 0 : i32
    %c0_i32_0 = arith.constant 0 : i32
    return %arg0, %c0_i32 : i32, i32
  }
  func.func @transform_1(%arg0: i32) -> (i32, i32) {
    %c0_i32 = arith.constant 0 : i32
    %c0_i32_0 = arith.constant 0 : i32
    return %arg0, %c0_i32 : i32, i32
  }
  func.func @transform_2(%arg0: i32) -> (i32, i32) {
    %c0_i32 = arith.constant 0 : i32
    %c0_i32_0 = arith.constant 0 : i32
    return %arg0, %c0_i32 : i32, i32
  }
}

</mosaic_0001>

<bundles_post_ra>
// kernel: tpu_custom_call.1
= control target key start
LH: loop header
LB: loop body
LE: loop exit
PB: predicated region body
PF: predicated region fallthrough
CT: control target
= control target key end

     0   :  { %7 = vsyncpa [#allocation3], 0  ;;  %s168_s0 = inlined_call_operand.hbm [shape: f32[8,512], index: 0, kind: input, shape index: {}]   ;;  %s169_s1 = inlined_call_operand.hbm [shape: f32[8,512], index: 1, kind: input, shape index: {}]   ;;  %s170_s2 = inlined_call_operand.hbm [shape: f32[8,512], index: 2, kind: output, shape index: {}]  }
   0x1   :  { %8 = vsyncpa [#allocation6], 0 }
   0x2   :  { %9 = vsyncpa [#allocation4], 0  ;;  %s141_s9 = smov [#allocation2]   ;;  %s142_s11 = smov [#allocation5]  }
   0x3   :  { %s16_s10 = sshll.u32 %s141_s9, 4  ;;  %s26_s12 = sshll.u32 %s142_s11, 4  ;;  %s17_s10 = int_to_ptr.vmem [resolvable:$true] %s16_s10  ;;  %s27_s12 = int_to_ptr.vmem [resolvable:$true] %s26_s12 }
   0x4   :  { %s83_s13 = scalar_lea.vmem %s17_s10, 512  ;;  %p88_p1 = scmp.lt.s32.totalorder %s17_s10, %s17_s10 }
   0x5   :  { %p84_p0 = scmp.ne.s32.totalorder %s17_s10, %s83_s13  ;;  %p89_p2 = scmp.lt.s32.totalorder %s83_s13, %s83_s13 }
   0x7   :  { %p90_p3 = por %p89_p2, %p88_p1 }
   0x9   :  { %p91_p4 = pnand %p90_p3, %p84_p0 }
   0xb   :  { %94 = shalt.err (!%p91_p4)
}
   0xc   :  { %19 = dma.hbm_to_vmem [thread:$0]  %s168_s0, 512, %s17_s10, [#allocation3]  }
   0xd   :  { %s103_s16 = scalar_lea.vmem %s27_s12, 512  ;;  %p108_p6 = scmp.lt.s32.totalorder %s27_s12, %s27_s12 }
   0xe   :  { %p104_p5 = scmp.ne.s32.totalorder %s27_s12, %s103_s16  ;;  %p109_p7 = scmp.lt.s32.totalorder %s103_s16, %s103_s16 }
  0x10   :  { %p110_p8 = por %p109_p7, %p108_p6 }
  0x12   :  { %p111_p9 = pnand %p110_p8, %p104_p5 }
  0x14   :  { %114 = shalt.err (!%p111_p9)
}
  0x15   :  { %29 = dma.hbm_to_vmem [thread:$0]  %s169_s1, 512, %s27_s12, [#allocation6]  }
  0x16   :  { %135 = dma.done.wait [#allocation3], 512  }
  0x17   :  { %136 = vsyncadd [#allocation3], 4294966784 }
  0x18   :  { %137 = dma.done.wait [#allocation6], 512  }
  0x19   :  { %138 = vsyncadd [#allocation6], 4294966784  ;;  %v36_v0 = vld [vmem:[#allocation5] sm:$0xff]  ;;  %v37_v2 = vld [vmem:[#allocation5 + $0x8] sm:$0xff]  ;;  %s143_s0 = smov [#allocation7]  }
  0x1a   :  { %v44_v1 = vld [vmem:[#allocation2] sm:$0xff]  ;;  %v40_v3 = vadd.f32 1.0, %v36_v0  ;;  %v41_v4 = vadd.f32 1.0, %v37_v2  ;;  %v45_v5 = vld [vmem:[#allocation2 + $0x8] sm:$0xff]  ;;  %v38_v6 = vld [vmem:[#allocation5 + $0x10] sm:$0xff]  ;;  %s62_s19 = sshll.u32 %s143_s0, 4  ;;  %s63_s19 = int_to_ptr.vmem [resolvable:$true] %s62_s19 }
  0x1b   :  { %v46_v7 = vld [vmem:[#allocation2 + $0x10] sm:$0xff]  ;;  %v42_v8 = vadd.f32 1.0, %v38_v6  ;;  %v39_v9 = vld [vmem:[#allocation5 + $0x18] sm:$0xff]  ;;  %s115_s1 = scalar_lea.vmem %s63_s19, 512  ;;  %p120_p11 = scmp.lt.s32.totalorder %s63_s19, %s63_s19 }
  0x1c   :  { %v47_v10 = vld [vmem:[#allocation2 + $0x18] sm:$0xff]  ;;  %v48_v11 = vmul.f32 %v44_v1, %v40_v3  ;;  %v49_v12 = vmul.f32 %v45_v5, %v41_v4  ;;  %v43_v13 = vadd.f32 1.0, %v39_v9  ;;  %p116_p10 = scmp.ne.s32.totalorder %s63_s19, %s115_s1  ;;  %p121_p12 = scmp.lt.s32.totalorder %s115_s1, %s115_s1 }
  0x1d   :  { %v50_v14 = vmul.f32 %v46_v7, %v42_v8 }
  0x1e   :  { %52 = vst [vmem:[#allocation7] sm:$0xff] %v48_v11  ;;  %53 = vst [vmem:[#allocation7 + $0x8] sm:$0xff] %v49_v12  ;;  %v51_v15 = vmul.f32 %v47_v10, %v43_v13  ;;  %p122_p13 = por %p121_p12, %p120_p11 }
  0x1f   :  { %54 = vst [vmem:[#allocation7 + $0x10] sm:$0xff] %v50_v14 }
  0x20   :  { %55 = vst [vmem:[#allocation7 + $0x18] sm:$0xff] %v51_v15  ;;  %p123_p0 = pnand %p122_p13, %p116_p10 }
  0x22   :  { %126 = shalt.err (!%p123_p0)
}
  0x23   :  { %65 = dma.vmem_to_hbm [thread:$0]  %s63_s19, 512, %s170_s2, [#allocation4]  }
  0x24   :  { %139 = dma.done.wait [#allocation4], 512  }
  0x25   :  { %140 = vsyncadd [#allocation4], 4294966784 }
  0x26   :  { %69 = vsyncpa [#allocation3], 1 }
  0x27   :  { %70 = vsyncpa [#allocation6], 1 }
  0x28   :  { %71 = vsyncpa [#allocation4], 1 }

</bundles_post_ra>
